<compile_context>
chip_gen: v5e
topology: v5e:2x2
jax: 0.10.0
libtpu: 0.0.40
codegen_flags: <defaults>
</compile_context>

<pallas_src>
import functools

import jax
import jax.numpy as jnp
from jax import lax
from jax.experimental import pallas as pl
from jax.experimental.pallas import tpu as pltpu


def _cross_attn_kernel(x_ref, wq_ref, wk_ref, wv_ref, wo_ref, bias_ref,
                       o_ref, k_scr, v_scr, *,
                       heads, dim_head, tq, compute_dtype):
    qi = pl.program_id(1)

    # ---- K/V projection: once per batch element, cached head-major in VMEM ----
    @pl.when(qi == 0)
    def _():
        xkv = x_ref[0].astype(compute_dtype)                                  # (n, dim)
        k = jnp.dot(xkv, wk_ref[...],
                    preferred_element_type=jnp.float32).astype(compute_dtype)  # (n, inner)
        v = jnp.dot(xkv, wv_ref[...],
                    preferred_element_type=jnp.float32).astype(compute_dtype)  # (n, inner)
        # One-off layout transform to head-major; amortized over all q-tiles.
        for h in range(heads):
            sl = slice(h * dim_head, (h + 1) * dim_head)
            k_scr[h] = k[:, sl]
            v_scr[h] = v[:, sl]

    # ---- Q projection for this query tile (softmax scale folded into Wq) ----
    q_start = qi * tq
    if tq % 8 == 0:
        q_start = pl.multiple_of(q_start, tq)
    xq = x_ref[0, pl.ds(q_start, tq), :].astype(compute_dtype)                # (tq, dim)
    q = jnp.dot(xq, wq_ref[...],
                preferred_element_type=jnp.float32).astype(compute_dtype)     # (tq, inner)
    # Head-major (heads, tq, dim_head); single layout transform per q-tile.
    qh = jnp.stack(
        [q[:, h * dim_head:(h + 1) * dim_head] for h in range(heads)], axis=0)

    kh = k_scr[...]                                                           # (heads, n, d)
    vh = v_scr[...]                                                           # (heads, n, d)

    # scores = q @ k^T per head, batched over heads; no k transpose materialized.
    s = lax.dot_general(qh, kh, (((2,), (2,)), ((0,), (0,))),
                        preferred_element_type=jnp.float32)                   # (heads, tq, n)

    # Softmax in f32 (v5e has no bf16 VPU/EUP path); reciprocal on the EUP.
    m = jnp.max(s, axis=-1, keepdims=True)
    p = jnp.exp(s - m)
    denom = jnp.sum(p, axis=-1, keepdims=True)
    attn = p * pl.reciprocal(denom, approx=True)
    # dropout(p=0.0) is identity.

    outh = lax.dot_general(attn.astype(compute_dtype), vh,
                           (((2,), (1,)), ((0,), (0,))),
                           preferred_element_type=jnp.float32)                # (heads, tq, d)

    # Output projection with head-major Wo (heads, dim_head, dim) + sum over
    # heads: avoids a lane-dim concatenate of the per-head outputs.
    o_parts = lax.dot_general(outh.astype(compute_dtype), wo_ref[...],
                              (((2,), (1,)), ((0,), (0,))),
                              preferred_element_type=jnp.float32)             # (heads, tq, dim)
    o = jnp.sum(o_parts, axis=0) + bias_ref[...]                              # (tq, dim)
    # TODO(synk): with dim < 128 these stores are lane-masked; pad dim or fold
    # tiles into the trailing axis if this becomes store-bound for real shapes.
    o_ref[0] = o.astype(o_ref.dtype)


def _vmem_capacity_bytes():
    try:
        return int(pltpu.get_tpu_info().vmem_capacity_bytes)
    except Exception:
        return 64 << 20   # conservative default (v7x per-TensorCore size)


def _pick_q_tile(n, vmem_capacity):
    # Bigger tiles amortize the ~0.35us/grid-step overhead; cap by generation
    # (128 MiB parts -> up to 512 rows, 64 MiB parts -> 256 rows).
    cap = 512 if vmem_capacity >= (96 << 20) else 256
    if n <= cap:
        return n                         # full-extent block (always layout-legal)
    for cand in (512, 256, 128, 64, 32, 16, 8):
        if cand <= cap and n % cand == 0:
            return cand
    return n


def cross_attention(x, w_qkv, w_out, b_out, *, heads, dim_head,
                    compute_dtype=jnp.bfloat16, q_tile=None):
    """Forward pass of Cross_Attention.

    x:      (B, N, D)
    w_qkv:  (3*heads*dim_head, D)  -- nn.Linear(dim, inner*3, bias=False).weight
    w_out:  (D, heads*dim_head)    -- nn.Linear(inner, dim).weight
    b_out:  (D,)                   -- nn.Linear(inner, dim).bias
    """
    b, n, dim = x.shape
    inner = heads * dim_head
    scale = dim_head ** (-0.5)
    assert w_qkv.shape == (3 * inner, dim)

    # nn.Linear: y = x @ W.T.  Pre-transpose host-side; fold the softmax scale
    # into Wq; keep Wk / Wv separate so no in-kernel slice splits a vreg; Wo in
    # head-major (heads, dim_head, dim) form for the in-kernel sum over heads.
    wq = (w_qkv[:inner].T * scale).astype(compute_dtype)              # (dim, inner)
    wk = w_qkv[inner:2 * inner].T.astype(compute_dtype)               # (dim, inner)
    wv = w_qkv[2 * inner:].T.astype(compute_dtype)                    # (dim, inner)
    wo = w_out.T.reshape(heads, dim_head, dim).astype(compute_dtype)  # (h, d, dim)
    bias = b_out.reshape(1, dim).astype(jnp.float32)

    vmem_cap = _vmem_capacity_bytes()
    tq = q_tile if q_tile is not None else _pick_q_tile(n, vmem_cap)
    assert n % tq == 0 and (tq % 8 == 0 or tq == n), "bad query tile"
    n_q_tiles = n // tq

    w_item = jnp.dtype(compute_dtype).itemsize
    x_item = x.dtype.itemsize

    # VMEM request from actual block / scratch / live-intermediate sizes.
    block_bytes = (2 * n * dim * x_item                               # x block
                   + 2 * tq * dim * x_item                            # out block
                   + 2 * (3 * dim * inner + inner * dim) * w_item     # wq,wk,wv,wo
                   + 2 * dim * 4)                                     # bias
    scratch_bytes = 2 * n * inner * w_item                            # K/V caches
    live_bytes = 4 * (2 * n * inner                                   # k,v f32 (proj step)
                      + 2 * tq * inner                                # q f32 + head-major q
                      + 2 * heads * tq * n                            # scores + probs f32
                      + tq * inner                                    # per-head attn out
                      + heads * tq * dim                              # per-head proj out
                      + tq * dim)
    gen_cap = (40 << 20) if vmem_cap <= (64 << 20) else (100 << 20)
    vmem_bytes = int(min(max(block_bytes + scratch_bytes + 2 * live_bytes + (8 << 20),
                             32 << 20), gen_cap))

    kernel = functools.partial(_cross_attn_kernel, heads=heads, dim_head=dim_head,
                               tq=tq, compute_dtype=compute_dtype)

    return pl.pallas_call(
        kernel,
        out_shape=jax.ShapeDtypeStruct((b, n, dim), x.dtype),
        grid_spec=pltpu.PrefetchScalarGridSpec(
            num_scalar_prefetch=0,
            grid=(b, n_q_tiles),
            in_specs=[
                pl.BlockSpec((1, n, dim), lambda i, qi: (i, 0, 0)),            # x
                pl.BlockSpec((dim, inner), lambda i, qi: (0, 0)),              # Wq*scale
                pl.BlockSpec((dim, inner), lambda i, qi: (0, 0)),              # Wk
                pl.BlockSpec((dim, inner), lambda i, qi: (0, 0)),              # Wv
                pl.BlockSpec((heads, dim_head, dim), lambda i, qi: (0, 0, 0)),  # Wo
                pl.BlockSpec((1, dim), lambda i, qi: (0, 0)),                  # bias
            ],
            out_specs=pl.BlockSpec((1, tq, dim), lambda i, qi: (i, qi, 0)),
            scratch_shapes=[
                pltpu.VMEM((heads, n, dim_head), compute_dtype),   # K cache (per batch)
                pltpu.VMEM((heads, n, dim_head), compute_dtype),   # V cache (per batch)
            ],
        ),
        compiler_params=pltpu.CompilerParams(
            # K/V scratch is carried across the q-tile axis -> "arbitrary";
            # the batch axis is megacore-"parallel".
            dimension_semantics=("parallel", "arbitrary"),
            vmem_limit_bytes=vmem_bytes),
    )(x, wq, wk, wv, wo, bias)


def _reference(x, w_qkv, w_out, b_out, *, heads, dim_head):
    b, n, dim = x.shape
    inner = heads * dim_head
    qkv = x @ w_qkv.T                                   # (b, n, 3*inner)
    q, k, v = jnp.split(qkv, 3, axis=-1)

    def split_heads(t):
        return t.reshape(b, n, heads, dim_head).transpose(0, 2, 1, 3)

    q, k, v = map(split_heads, (q, k, v))
    dots = jnp.einsum('bhnd,bhmd->bhnm', q, k) * (dim_head ** -0.5)
    attn = jax.nn.softmax(dots, axis=-1)
    out = jnp.einsum('bhnm,bhmd->bhnd', attn, v)
    out = out.transpose(0, 2, 1, 3).reshape(b, n, inner)
    return out @ w_out.T + b_out


if __name__ == "__main__":
    # Small shapes consistent with the module.
    B, N, DIM = 2, 16, 32
    HEADS, DIM_HEAD = 4, 16
    INNER = HEADS * DIM_HEAD

    key = jax.random.PRNGKey(0)
    kx, kqkv, kwo, kbo = jax.random.split(key, 4)

    x = jax.random.normal(kx, (B, N, DIM), dtype=jnp.float32)
    # Deterministic synthetic parameters (same shapes as the nn.Module weights).
    w_qkv = jax.random.normal(kqkv, (3 * INNER, DIM), dtype=jnp.float32) * (DIM ** -0.5)
    w_out = jax.random.normal(kwo, (DIM, INNER), dtype=jnp.float32) * (INNER ** -0.5)
    b_out = jax.random.normal(kbo, (DIM,), dtype=jnp.float32) * 0.01

    y_ref = _reference(x, w_qkv, w_out, b_out, heads=HEADS, dim_head=DIM_HEAD)

    # f32 compute path, default (single) q-tile: validates kernel structure
    # tightly (tolerance covers the approx-EUP reciprocal in the softmax).
    y32 = cross_attention(x, w_qkv, w_out, b_out, heads=HEADS, dim_head=DIM_HEAD,
                          compute_dtype=jnp.float32)
    y32 = jax.block_until_ready(y32)
    assert y32.shape == (B, N, DIM)
    assert jnp.allclose(y32, y_ref, atol=5e-3, rtol=5e-3), "f32 path mismatch"

    # f32 path with a forced smaller q-tile: exercises the carried K/V cache
    # across the "arbitrary" q-tile grid axis (pl.when(qi == 0) init).
    y32t = cross_attention(x, w_qkv, w_out, b_out, heads=HEADS, dim_head=DIM_HEAD,
                           compute_dtype=jnp.float32, q_tile=8)
    y32t = jax.block_until_ready(y32t)
    assert jnp.allclose(y32t, y_ref, atol=5e-3, rtol=5e-3), "tiled path mismatch"

    # Default bf16-MXU path (f32 accumulation / f32 softmax).
    y = cross_attention(x, w_qkv, w_out, b_out, heads=HEADS, dim_head=DIM_HEAD)
    y = jax.block_until_ready(y)
    assert y.shape == (B, N, DIM)
    assert jnp.allclose(y, y_ref, atol=3e-2, rtol=3e-2), "bf16 path mismatch"

    print("KERNEL_OK")
</pallas_src>

<mosaic_0001>
module attributes {stable_mosaic.version = 11 : i64} {
  func.func @_cross_attn_kernel(%arg0: i32, %arg1: i32, %arg2: memref<1x16x32xf32, #tpu.memory_space<vmem>>, %arg3: memref<32x64xf32, #tpu.memory_space<vmem>>, %arg4: memref<32x64xf32, #tpu.memory_space<vmem>>, %arg5: memref<32x64xf32, #tpu.memory_space<vmem>>, %arg6: memref<4x16x32xf32, #tpu.memory_space<vmem>>, %arg7: memref<1x32xf32, #tpu.memory_space<vmem>>, %arg8: memref<1x16x32xf32, #tpu.memory_space<vmem>>, %arg9: memref<4x16x16xf32, #tpu.memory_space<vmem>>, %arg10: memref<4x16x16xf32, #tpu.memory_space<vmem>>) attributes {dimension_semantics = [#tpu.dimension_semantics<parallel>, #tpu.dimension_semantics<arbitrary>], iteration_bounds = array<i64: 2, 1>, scalar_prefetch = 0 : i64, scratch_operands = 2 : i64, tpu.core_type = #tpu.core_type<tc>, window_params = [{transform_indices = @transform_0, window_bounds = array<i64: 1, 16, 32>}, {pipeline_mode = #tpu.pipeline_mode<synchronous>, transform_indices = @transform_1, window_bounds = array<i64: 32, 64>}, {pipeline_mode = #tpu.pipeline_mode<synchronous>, transform_indices = @transform_2, window_bounds = array<i64: 32, 64>}, {pipeline_mode = #tpu.pipeline_mode<synchronous>, transform_indices = @transform_3, window_bounds = array<i64: 32, 64>}, {pipeline_mode = #tpu.pipeline_mode<synchronous>, transform_indices = @transform_4, window_bounds = array<i64: 4, 16, 32>}, {pipeline_mode = #tpu.pipeline_mode<synchronous>, transform_indices = @transform_5, window_bounds = array<i64: 1, 32>}, {transform_indices = @transform_6, window_bounds = array<i64: 1, 16, 32>}]} {
    %c0_i32 = arith.constant 0 : i32
    %0 = arith.cmpi eq, %arg1, %c0_i32 : i32
    %1 = arith.extui %0 : i1 to i32
    %c0_i32_0 = arith.constant 0 : i32
    %2 = arith.cmpi ne, %1, %c0_i32_0 : i32
    scf.if %2 {
      %c0_24 = arith.constant 0 : index
      %c0_25 = arith.constant 0 : index
      %c0_26 = arith.constant 0 : index
      %42 = vector.load %arg2[%c0_24, %c0_25, %c0_26] : memref<1x16x32xf32, #tpu.memory_space<vmem>>, vector<1x16x32xf32>
      %43 = vector.shape_cast %42 : vector<1x16x32xf32> to vector<16x32xf32>
      %c0_27 = arith.constant 0 : index
      %c0_28 = arith.constant 0 : index
      %44 = vector.load %arg4[%c0_27, %c0_28] : memref<32x64xf32, #tpu.memory_space<vmem>>, vector<32x64xf32>
      %cst_29 = arith.constant dense<0.000000e+00> : vector<16x64xf32>
      %45 = tpu.matmul %43, %44, %cst_29 {dimension_numbers = #tpu.dot_dimension_numbers<[1], [0], [0], [1], [0, 0, 1, 1], [], []>} : vector<16x32xf32>, vector<32x64xf32>, vector<16x64xf32> -> vector<16x64xf32>
      %c0_30 = arith.constant 0 : index
      %c0_31 = arith.constant 0 : index
      %46 = vector.load %arg5[%c0_30, %c0_31] : memref<32x64xf32, #tpu.memory_space<vmem>>, vector<32x64xf32>
      %cst_32 = arith.constant dense<0.000000e+00> : vector<16x64xf32>
      %47 = tpu.matmul %43, %46, %cst_32 {dimension_numbers = #tpu.dot_dimension_numbers<[1], [0], [0], [1], [0, 0, 1, 1], [], []>} : vector<16x32xf32>, vector<32x64xf32>, vector<16x64xf32> -> vector<16x64xf32>
      %48 = vector.extract_strided_slice %45 {offsets = [0, 0], sizes = [16, 16], strides = [1, 1]} : vector<16x64xf32> to vector<16x16xf32>
      %c0_33 = arith.constant 0 : index
      %c0_34 = arith.constant 0 : index
      %c0_35 = arith.constant 0 : index
      %49 = vector.load %arg9[%c0_33, %c0_34, %c0_35] : memref<4x16x16xf32, #tpu.memory_space<vmem>>, vector<1x16x16xf32>
      %50 = vector.shape_cast %49 : vector<1x16x16xf32> to vector<16x16xf32>
      %51 = vector.shape_cast %48 : vector<16x16xf32> to vector<1x16x16xf32>
      tpu.vector_store %arg9[%c0_33, %c0_34, %c0_35], %51 {strides = array<i32>} : memref<4x16x16xf32, #tpu.memory_space<vmem>>, vector<1x16x16xf32>,
      %52 = vector.extract_strided_slice %47 {offsets = [0, 0], sizes = [16, 16], strides = [1, 1]} : vector<16x64xf32> to vector<16x16xf32>
      %c0_36 = arith.constant 0 : index
      %c0_37 = arith.constant 0 : index
      %c0_38 = arith.constant 0 : index
      %53 = vector.load %arg10[%c0_36, %c0_37, %c0_38] : memref<4x16x16xf32, #tpu.memory_space<vmem>>, vector<1x16x16xf32>
      %54 = vector.shape_cast %53 : vector<1x16x16xf32> to vector<16x16xf32>
      %55 = vector.shape_cast %52 : vector<16x16xf32> to vector<1x16x16xf32>
      tpu.vector_store %arg10[%c0_36, %c0_37, %c0_38], %55 {strides = array<i32>} : memref<4x16x16xf32, #tpu.memory_space<vmem>>, vector<1x16x16xf32>,
      %56 = vector.extract_strided_slice %45 {offsets = [0, 16], sizes = [16, 16], strides = [1, 1]} : vector<16x64xf32> to vector<16x16xf32>
      %c1 = arith.constant 1 : index
      %c0_39 = arith.constant 0 : index
      %c0_40 = arith.constant 0 : index
      %57 = vector.load %arg9[%c1, %c0_39, %c0_40] : memref<4x16x16xf32, #tpu.memory_space<vmem>>, vector<1x16x16xf32>
      %58 = vector.shape_cast %57 : vector<1x16x16xf32> to vector<16x16xf32>
      %59 = vector.shape_cast %56 : vector<16x16xf32> to vector<1x16x16xf32>
      tpu.vector_store %arg9[%c1, %c0_39, %c0_40], %59 {strides = array<i32>} : memref<4x16x16xf32, #tpu.memory_space<vmem>>, vector<1x16x16xf32>,
      %60 = vector.extract_strided_slice %47 {offsets = [0, 16], sizes = [16, 16], strides = [1, 1]} : vector<16x64xf32> to vector<16x16xf32>
      %c1_41 = arith.constant 1 : index
      %c0_42 = arith.constant 0 : index
      %c0_43 = arith.constant 0 : index
      %61 = vector.load %arg10[%c1_41, %c0_42, %c0_43] : memref<4x16x16xf32, #tpu.memory_space<vmem>>, vector<1x16x16xf32>
      %62 = vector.shape_cast %61 : vector<1x16x16xf32> to vector<16x16xf32>
      %63 = vector.shape_cast %60 : vector<16x16xf32> to vector<1x16x16xf32>
      tpu.vector_store %arg10[%c1_41, %c0_42, %c0_43], %63 {strides = array<i32>} : memref<4x16x16xf32, #tpu.memory_space<vmem>>, vector<1x16x16xf32>,
      %64 = vector.extract_strided_slice %45 {offsets = [0, 32], sizes = [16, 16], strides = [1, 1]} : vector<16x64xf32> to vector<16x16xf32>
      %c2 = arith.constant 2 : index
      %c0_44 = arith.constant 0 : index
      %c0_45 = arith.constant 0 : index
      %65 = vector.load %arg9[%c2, %c0_44, %c0_45] : memref<4x16x16xf32, #tpu.memory_space<vmem>>, vector<1x16x16xf32>
      %66 = vector.shape_cast %65 : vector<1x16x16xf32> to vector<16x16xf32>
      %67 = vector.shape_cast %64 : vector<16x16xf32> to vector<1x16x16xf32>
      tpu.vector_store %arg9[%c2, %c0_44, %c0_45], %67 {strides = array<i32>} : memref<4x16x16xf32, #tpu.memory_space<vmem>>, vector<1x16x16xf32>,
      %68 = vector.extract_strided_slice %47 {offsets = [0, 32], sizes = [16, 16], strides = [1, 1]} : vector<16x64xf32> to vector<16x16xf32>
      %c2_46 = arith.constant 2 : index
      %c0_47 = arith.constant 0 : index
      %c0_48 = arith.constant 0 : index
      %69 = vector.load %arg10[%c2_46, %c0_47, %c0_48] : memref<4x16x16xf32, #tpu.memory_space<vmem>>, vector<1x16x16xf32>
      %70 = vector.shape_cast %69 : vector<1x16x16xf32> to vector<16x16xf32>
      %71 = vector.shape_cast %68 : vector<16x16xf32> to vector<1x16x16xf32>
      tpu.vector_store %arg10[%c2_46, %c0_47, %c0_48], %71 {strides = array<i32>} : memref<4x16x16xf32, #tpu.memory_space<vmem>>, vector<1x16x16xf32>,
      %72 = vector.extract_strided_slice %45 {offsets = [0, 48], sizes = [16, 16], strides = [1, 1]} : vector<16x64xf32> to vector<16x16xf32>
      %c3 = arith.constant 3 : index
      %c0_49 = arith.constant 0 : index
      %c0_50 = arith.constant 0 : index
      %73 = vector.load %arg9[%c3, %c0_49, %c0_50] : memref<4x16x16xf32, #tpu.memory_space<vmem>>, vector<1x16x16xf32>
      %74 = vector.shape_cast %73 : vector<1x16x16xf32> to vector<16x16xf32>
      %75 = vector.shape_cast %72 : vector<16x16xf32> to vector<1x16x16xf32>
      tpu.vector_store %arg9[%c3, %c0_49, %c0_50], %75 {strides = array<i32>} : memref<4x16x16xf32, #tpu.memory_space<vmem>>, vector<1x16x16xf32>,
      %76 = vector.extract_strided_slice %47 {offsets = [0, 48], sizes = [16, 16], strides = [1, 1]} : vector<16x64xf32> to vector<16x16xf32>
      %c3_51 = arith.constant 3 : index
      %c0_52 = arith.constant 0 : index
      %c0_53 = arith.constant 0 : index
      %77 = vector.load %arg10[%c3_51, %c0_52, %c0_53] : memref<4x16x16xf32, #tpu.memory_space<vmem>>, vector<1x16x16xf32>
      %78 = vector.shape_cast %77 : vector<1x16x16xf32> to vector<16x16xf32>
      %79 = vector.shape_cast %76 : vector<16x16xf32> to vector<1x16x16xf32>
      tpu.vector_store %arg10[%c3_51, %c0_52, %c0_53], %79 {strides = array<i32>} : memref<4x16x16xf32, #tpu.memory_space<vmem>>, vector<1x16x16xf32>,
    } else {
    }
    %c16_i32 = arith.constant 16 : i32
    %3 = arith.muli %arg1, %c16_i32 : i32
    %4 = tpu.assume_multiple %3, 16 : i32
    %c0 = arith.constant 0 : index
    %5 = arith.index_cast %4 : i32 to index
    %c0_1 = arith.constant 0 : index
    %6 = vector.load %arg2[%c0, %5, %c0_1] : memref<1x16x32xf32, #tpu.memory_space<vmem>>, vector<1x16x32xf32>
    %7 = vector.shape_cast %6 : vector<1x16x32xf32> to vector<16x32xf32>
    %c0_2 = arith.constant 0 : index
    %c0_3 = arith.constant 0 : index
    %8 = vector.load %arg3[%c0_2, %c0_3] : memref<32x64xf32, #tpu.memory_space<vmem>>, vector<32x64xf32>
    %cst = arith.constant dense<0.000000e+00> : vector<16x64xf32>
    %9 = tpu.matmul %7, %8, %cst {dimension_numbers = #tpu.dot_dimension_numbers<[1], [0], [0], [1], [0, 0, 1, 1], [], []>} : vector<16x32xf32>, vector<32x64xf32>, vector<16x64xf32> -> vector<16x64xf32>
    %10 = vector.extract_strided_slice %9 {offsets = [0, 0], sizes = [16, 16], strides = [1, 1]} : vector<16x64xf32> to vector<16x16xf32>
    %11 = vector.extract_strided_slice %9 {offsets = [0, 16], sizes = [16, 16], strides = [1, 1]} : vector<16x64xf32> to vector<16x16xf32>
    %12 = vector.extract_strided_slice %9 {offsets = [0, 32], sizes = [16, 16], strides = [1, 1]} : vector<16x64xf32> to vector<16x16xf32>
    %13 = vector.extract_strided_slice %9 {offsets = [0, 48], sizes = [16, 16], strides = [1, 1]} : vector<16x64xf32> to vector<16x16xf32>
    %14 = vector.shape_cast %10 : vector<16x16xf32> to vector<1x16x16xf32>
    %15 = vector.shape_cast %11 : vector<16x16xf32> to vector<1x16x16xf32>
    %16 = vector.shape_cast %12 : vector<16x16xf32> to vector<1x16x16xf32>
    %17 = vector.shape_cast %13 : vector<16x16xf32> to vector<1x16x16xf32>
    %18 = tpu.concatenate %14, %15, %16, %17 in 0 : vector<1x16x16xf32>, vector<1x16x16xf32>, vector<1x16x16xf32>, vector<1x16x16xf32> -> vector<4x16x16xf32>
    %c0_4 = arith.constant 0 : index
    %c0_5 = arith.constant 0 : index
    %c0_6 = arith.constant 0 : index
    %19 = vector.load %arg9[%c0_4, %c0_5, %c0_6] : memref<4x16x16xf32, #tpu.memory_space<vmem>>, vector<4x16x16xf32>
    %c0_7 = arith.constant 0 : index
    %c0_8 = arith.constant 0 : index
    %c0_9 = arith.constant 0 : index
    %20 = vector.load %arg10[%c0_7, %c0_8, %c0_9] : memref<4x16x16xf32, #tpu.memory_space<vmem>>, vector<4x16x16xf32>
    %cst_10 = arith.constant dense<0.000000e+00> : vector<4x16x16xf32>
    %21 = tpu.matmul %18, %19, %cst_10 {dimension_numbers = #tpu.dot_dimension_numbers<[2], [2], [1], [1], [0, 0, 0, 1, 1, 1], [0], [0]>} : vector<4x16x16xf32>, vector<4x16x16xf32>, vector<4x16x16xf32> -> vector<4x16x16xf32>
    %cst_11 = arith.constant dense<0xFF800000> : vector<4x16xf32>
    %22 = vector.multi_reduction <maximumf>, %21, %cst_11 [2] : vector<4x16x16xf32> to vector<4x16xf32>
    %23 = vector.shape_cast %22 : vector<4x16xf32> to vector<4x16x1xf32>
    %24 = vector.broadcast %23 : vector<4x16x1xf32> to vector<4x16x16xf32>
    %25 = arith.subf %21, %24 : vector<4x16x16xf32>
    %26 = math.exp %25 : vector<4x16x16xf32>
    %cst_12 = arith.constant dense<0.000000e+00> : vector<4x16xf32>
    %27 = vector.multi_reduction <add>, %26, %cst_12 [2] : vector<4x16x16xf32> to vector<4x16xf32>
    %28 = vector.shape_cast %27 : vector<4x16xf32> to vector<4x16x1xf32>
    %29 = tpu.reciprocal %28 {approx = true} : vector<4x16x1xf32> -> vector<4x16x1xf32>
    %30 = vector.broadcast %29 : vector<4x16x1xf32> to vector<4x16x16xf32>
    %31 = arith.mulf %26, %30 : vector<4x16x16xf32>
    %cst_13 = arith.constant dense<0.000000e+00> : vector<4x16x16xf32>
    %32 = tpu.matmul %31, %20, %cst_13 {dimension_numbers = #tpu.dot_dimension_numbers<[2], [1], [1], [2], [0, 0, 0, 1, 1, 2], [0], [0]>} : vector<4x16x16xf32>, vector<4x16x16xf32>, vector<4x16x16xf32> -> vector<4x16x16xf32>
    %c0_14 = arith.constant 0 : index
    %c0_15 = arith.constant 0 : index
    %c0_16 = arith.constant 0 : index
    %33 = vector.load %arg6[%c0_14, %c0_15, %c0_16] : memref<4x16x32xf32, #tpu.memory_space<vmem>>, vector<4x16x32xf32>
    %cst_17 = arith.constant dense<0.000000e+00> : vector<4x16x32xf32>
    %34 = tpu.matmul %32, %33, %cst_17 {dimension_numbers = #tpu.dot_dimension_numbers<[2], [1], [1], [2], [0, 0, 0, 1, 1, 2], [0], [0]>} : vector<4x16x16xf32>, vector<4x16x32xf32>, vector<4x16x32xf32> -> vector<4x16x32xf32>
    %cst_18 = arith.constant dense<0.000000e+00> : vector<16x32xf32>
    %35 = vector.multi_reduction <add>, %34, %cst_18 [0] : vector<4x16x32xf32> to vector<16x32xf32>
    %c0_19 = arith.constant 0 : index
    %c0_20 = arith.constant 0 : index
    %36 = vector.load %arg7[%c0_19, %c0_20] : memref<1x32xf32, #tpu.memory_space<vmem>>, vector<1x32xf32>
    %37 = vector.broadcast %36 : vector<1x32xf32> to vector<16x32xf32>
    %38 = arith.addf %35, %37 : vector<16x32xf32>
    %c0_21 = arith.constant 0 : index
    %c0_22 = arith.constant 0 : index
    %c0_23 = arith.constant 0 : index
    %39 = vector.load %arg8[%c0_21, %c0_22, %c0_23] : memref<1x16x32xf32, #tpu.memory_space<vmem>>, vector<1x16x32xf32>
    %40 = vector.shape_cast %39 : vector<1x16x32xf32> to vector<16x32xf32>
    %41 = vector.shape_cast %38 : vector<16x32xf32> to vector<1x16x32xf32>
    tpu.vector_store %arg8[%c0_21, %c0_22, %c0_23], %41 {strides = array<i32>} : memref<1x16x32xf32, #tpu.memory_space<vmem>>, vector<1x16x32xf32>,
    return
  }
  func.func @transform_0(%arg0: i32, %arg1: i32) -> (i32, i32, i32) {
    %c0_i32 = arith.constant 0 : i32
    %c0_i32_0 = arith.constant 0 : i32
    %c0_i32_1 = arith.constant 0 : i32
    return %arg0, %c0_i32, %c0_i32_0 : i32, i32, i32
  }
  func.func @transform_1(%arg0: i32, %arg1: i32) -> (i32, i32) {
    %c0_i32 = arith.constant 0 : i32
    %c0_i32_0 = arith.constant 0 : i32
    %c0_i32_1 = arith.constant 0 : i32
    return %c0_i32, %c0_i32_0 : i32, i32
  }
  func.func @transform_2(%arg0: i32, %arg1: i32) -> (i32, i32) {
    %c0_i32 = arith.constant 0 : i32
    %c0_i32_0 = arith.constant 0 : i32
    %c0_i32_1 = arith.constant 0 : i32
    return %c0_i32, %c0_i32_0 : i32, i32
  }
  func.func @transform_3(%arg0: i32, %arg1: i32) -> (i32, i32) {
    %c0_i32 = arith.constant 0 : i32
    %c0_i32_0 = arith.constant 0 : i32
    %c0_i32_1 = arith.constant 0 : i32
    return %c0_i32, %c0_i32_0 : i32, i32
  }
  func.func @transform_4(%arg0: i32, %arg1: i32) -> (i32, i32, i32) {
    %c0_i32 = arith.constant 0 : i32
    %c0_i32_0 = arith.constant 0 : i32
    %c0_i32_1 = arith.constant 0 : i32
    %c0_i32_2 = arith.constant 0 : i32
    return %c0_i32, %c0_i32_0, %c0_i32_1 : i32, i32, i32
  }
  func.func @transform_5(%arg0: i32, %arg1: i32) -> (i32, i32) {
    %c0_i32 = arith.constant 0 : i32
    %c0_i32_0 = arith.constant 0 : i32
    %c0_i32_1 = arith.constant 0 : i32
    return %c0_i32, %c0_i32_0 : i32, i32
  }
  func.func @transform_6(%arg0: i32, %arg1: i32) -> (i32, i32, i32) {
    %c0_i32 = arith.constant 0 : i32
    %c0_i32_0 = arith.constant 0 : i32
    return %arg0, %arg1, %c0_i32 : i32, i32, i32
  }
}

</mosaic_0001>

<bundles_post_ra>
// kernel: tpu_custom_call.1
= control target key start
LH: loop header
LB: loop body
LE: loop exit
PB: predicated region body
PF: predicated region fallthrough
CT: control target
= control target key end

     0   :  { %s1986_s0 = inlined_call_operand.hbm [shape: f32[2,16,32], index: 0, kind: input, shape index: {}]   ;;  %s1987_s1 = inlined_call_operand.hbm [shape: f32[32,64], index: 1, kind: input, shape index: {}]   ;;  %s1988_s2 = inlined_call_operand.hbm [shape: f32[32,64], index: 2, kind: input, shape index: {}]   ;;  %s1989_s3 = inlined_call_operand.hbm [shape: f32[32,64], index: 3, kind: input, shape index: {}]   ;;  %s1990_s4 = inlined_call_operand.hbm [shape: f32[4,16,32], index: 4, kind: input, shape index: {}]   ;;  %s1991_s5 = inlined_call_operand.vmem [shape: f32[1,32], index: 5, kind: input, shape index: {}]   ;;  %s1992_s6 = inlined_call_operand.hbm [shape: f32[2,16,32], index: 6, kind: output, shape index: {}]  }
   0x1   :  { %1995 = sst [smem:[#allocation18_spill]] %s1987_s1 }
   0x2   :  { %1996 = sst [smem:[#allocation19_spill]] %s1988_s2 }
   0x3   :  { %1997 = sst [smem:[#allocation20_spill]] %s1989_s3 }
   0x4   :  { %11 = vsyncpa [#allocation5], 0 }
   0x5   :  { %13 = vsyncpa [#allocation5 + $0x1], 0 }
   0x6   :  { %14 = vsyncpa [#allocation8], 0 }
   0x7   :  { %15 = vsyncpa [#allocation11], 0 }
   0x8   :  { %16 = vsyncpa [#allocation6], 0 }
   0x9   :  { %18 = vsyncpa [#allocation6 + $0x1], 0  ;;  %s1674_s21 = smov 0   ;;  %s1676_s22 = smov 0  }
   0xa   :  { %s1678_s23 = smov 0   ;;  %s1680_s24 = smov 0  }
   0xb   :  { %s1682_s25 = smov 0   ;;  %s1684_s26 = smov 0  }
   0xc LB: > { %s1176_s27 = sadd.s32 4294967295, %s1626_s26   ;;  %s1177_s28 = sadd.s32 4294967294, %s1626_s26   ;;  %s1626_s26 = sphi %s1684_s26, %s24_s26   ;;  %s1622_s25 = sphi %s1682_s25, %s2013_s25   ;;  %s1618_s24 = sphi %s1680_s24, %s2012_s24   ;;  %s1614_s23 = sphi %s1678_s23, %s2011_s23   ;;  %s1610_s22 = sphi %s1676_s22, %s2010_s22   ;;  %s1606_s21 = sphi %s1674_s21, %s2009_s21  }
   0xd   : > { %p56_p0 = scmp.ne.s32.totalorder %s1610_s22, %s1606_s21  ;;  %p1710_p1 = scmp.eq.s32.totalorder %s1176_s27, 0 }
   0xe   : > { %p193_p2 = scmp.eq.s32.totalorder %s1177_s28, 1  ;;  %p1178_p4 = scmp.ge.s32.totalorder %s1626_s26, 1 }
   0xf   : > { %p1716_p3 = por %p1710_p1, %p56_p0  ;;  %p200_p6 = scmp.lt.s32.totalorder %s1626_s26, 3 }
  0x10   : > { %p1721_p5 = por %p193_p2, %p56_p0  ;;  %s2001_s1 = sld [smem:[#allocation18_spill]] }
  0x11   : > { %p1729_p7 = pnand %p1178_p4, %p200_p6  ;;  %s1628_s12 = smov [#allocation7]  }
  0x12   : > { %s213_s13 = sshll.u32 %s1628_s12, 4  ;;  %p1183_p10 = scmp.ge.s32.totalorder %s1626_s26, 2  ;;  %s214_s13 = int_to_ptr.vmem [resolvable:$true] %s213_s13 }
  0x13   : > { %p1263_p8 = pneg %p1729_p7  ;;  %s2004_s3 = sld [smem:[#allocation20_spill]] }
  0x14   : > { %s1993_s18 = smov 128   ;;  %s1994_s19 = smov 8  }
  0x15   : > { %p1737_p9 = pnand %p1263_p8, %p1710_p1  ;;  %s1631_s20 = smov [#allocation10]  }
  0x16   : > { %s211_s10 = sshll.u32 %s2001_s1, 4  ;;  %s241_s28 = sshll.u32 %s1631_s20, 4  ;;  %s212_s10 = int_to_ptr.hbm [resolvable:$true] %s211_s10  ;;  %s242_s28 = int_to_ptr.vmem [resolvable:$true] %s241_s28 }
  0x17   : > { %1266 = dma.hbm_to_vmem [thread:$0]  (!%p1737_p9), %s212_s10, 512, %s214_s13, [#allocation8], %s1993_s18, %s1993_s18, %s1994_s19  }
  0x18   : > { %s2005_s2 = sld [smem:[#allocation19_spill]]  ;;  %s253_s15 = sshll.u32 %s1990_s4, 4  ;;  %s254_s15 = int_to_ptr.hbm [resolvable:$true] %s253_s15 }
  0x19   : > { %s239_s17 = sshll.u32 %s2004_s3, 4  ;;  %s1632_s16 = smov [#allocation9]   ;;  %s240_s17 = int_to_ptr.hbm [resolvable:$true] %s239_s17 }
  0x1a   : > { %1272 = dma.hbm_to_vmem [thread:$0]  (!%p1737_p9), %s240_s17, 512, %s242_s28, [#allocation11], %s1993_s18, %s1993_s18, %s1994_s19  }
  0x1b   : > { %s227_s20 = sshll.u32 %s1632_s16, 4  ;;  %s1633_s8 = smov [#allocation12]   ;;  %s228_s20 = int_to_ptr.vmem [resolvable:$true] %s227_s20 }
  0x1c   : > { %s255_s9 = sshll.u32 %s1633_s8, 4  ;;  %p187_p11 = scmp.eq.s32.totalorder %s1176_s27, 1  ;;  %s256_s9 = int_to_ptr.vmem [resolvable:$true] %s255_s9 }
  0x1d   : > { %1275 = dma.hbm_to_vmem [thread:$0]  (!%p1737_p9), %s254_s15, 1024, %s256_s9, [#allocation11], %s1993_s18, %s1993_s18, %s1994_s19  }
  0x1e   : > { %s225_s12 = sshll.u32 %s2005_s2, 4  ;;  %s36_s17 = sadd.s32 1, %s1622_s25  ;;  %s226_s12 = int_to_ptr.hbm [resolvable:$true] %s225_s12 }
  0x1f   : > { %1269 = dma.hbm_to_vmem [thread:$0]  (!%p1737_p9), %s226_s12, 512, %s228_s20, [#allocation8], %s1993_s18, %s1993_s18, %s1994_s19  }
  0x20   : > { %p38_p12 = scmp.ge.s32.totalorder %s36_s17, 2  ;;  %s43_s28 = sadd.s32 1, %s1614_s23 }
  0x21   : > { %p50_p13 = scmp.ne.s32.totalorder %s1614_s23, %s1610_s22  ;;  %p51_p0 = scmp.eq.s32.totalorder %s1626_s26, 0 }
  0x22   : > { %s2015_s17 = smov (%p38_p12, %s36_s17), 0  ;;  %p1288_p4 = scmp.lt.s32.totalorder %s1626_s26, 2 }
  0x23   : > { %p1780_p2 = por %p187_p11, %p50_p13  ;;  %s40_s14 = ssub.s32 %s1622_s25, %s2015_s17 }
  0x24   : > { %s272_s10 = sand.u32 1, %s1614_s23   ;;  %p41_p6 = scmp.eq.s32.totalorder %s40_s14, 0 }
  0x25   : > { %p52_p8 = por %p51_p0, %p50_p13  ;;  %s1184_s13 = sshll.u32 %s272_s10, 4 }
  0x26   : > { %s1237_s27 = sshll.u32 %s1622_s25, 4  ;;  %s276_s18 = scalar_lea.vmem [#allocation4], %s1184_s13 }
  0x27   : > { %s1790_s15 = scalar_select %p41_p6, %s1614_s23, %s43_s28  }
  0x28   : > { %s281_s8 = scalar_lea.hbm %s1986_s0, %s1237_s27  ;;  %s284_s19 = sshll.u32 %s276_s18, 4  ;;  %s285_s19 = int_to_ptr.vmem [resolvable:$true] %s284_s19 }
  0x29   : > { %s282_s9 = sshll.u32 %s281_s8, 4  ;;  %p1277_p9 = pnand %p1288_p4, %p52_p8  ;;  %s283_s9 = int_to_ptr.hbm [resolvable:$true] %s282_s9 }
  0x2a   : > { %s273_s1 = scalar_lea.sflag [#allocation5], %s272_s10  ;;  %s2007_s2 = smov 8  }
  0x2b   : > { %s2008_s3 = smov 128   ;;  %296 = sbr.rel (%p1729_p7) target bundleno = 1057 (0x421), region = 44 }
  0x2c   : > { %1279 = dma.hbm_to_vmem [thread:$0]  (!%p1277_p9), %s283_s9, 256, %s285_s19, %s273_s1, %s2008_s3, %s2008_s3, %s2007_s2  }
  0x2d   : > { %s1803_s28 = sand.u32 (!%p1729_p7), 1, %s1610_s22  }
  0x2e   : > { %s1188_s18 = sshll.u32 (!%p1729_p7), %s1803_s28, 4  ;;  %s299_s14 = scalar_lea.sflag (!%p1729_p7), [#allocation5], %s1803_s28 }
  0x2f   : > { %s302_s13 = scalar_lea.vmem (!%p1729_p7), [#allocation4], %s1188_s18 }
  0x30   : > { %1589 = dma.done.wait (%p1716_p3), %s299_s14, 256  }
  0x31   : > { %1591 = vsyncadd (%p1716_p3), %s299_s14, 4294967040 }
  0x32   : > { %1593 = dma.done.wait (%p1710_p1), [#allocation8], 1024  }
  0x33   : > { %1595 = vsyncadd (%p1710_p1), [#allocation8], 4294966272 }
  0x34   : > { %1597 = dma.done.wait (%p1710_p1), [#allocation11], 1536  }
  0x35   : > { %1599 = vsyncadd (%p1710_p1), [#allocation11], 4294965760  ;;  %v362_v0 = vld [vmem:[#allocation9 + $0x18] sm:$0xff]  ;;  %v361_v1 = vld [vmem:[#allocation9 + $0x10] sm:$0xff]  ;;  %vm363_vm0 = vcmask 261120   ;;  %vm420_vm1 = vcmask 130048  }
  0x36   : > { %1239 = vmatpush.msra.mxu3 %v362_v0  ;;  %v490_v2 = vld [vmem:[#allocation7 + $0x18] sm:$0xff]  ;;  %382 = vmatpush.msra.mxu0 %v362_v0  ;;  %v360_v3 = vld [vmem:[#allocation9 + $0x8] sm:$0xff]  ;;  %v489_v4 = vld [vmem:[#allocation7 + $0x10] sm:$0xff]  ;;  %s1634_s1 = smov 96   ;;  %s1635_s2 = smov 112  }
  0x37   : > { %510 = vmatpush.msra.mxu2 %v490_v2  ;;  %v488_v5 = vld [vmem:[#allocation7 + $0x8] sm:$0xff]  ;;  %v396_v6 = vld [vmem:[#allocation10 + $0x18] sm:$0xff]  ;;  %v395_v7 = vld [vmem:[#allocation10 + $0x10] sm:$0xff]  ;;  %s1636_s3 = smov 80   ;;  %s1238_s11 = sshll.u32 %s1618_s24, 4 }
  0x38   : > { %1240 = vmatpush.msra.mxu3 %v361_v1  ;;  %383 = vmatpush.msra.mxu0 %v361_v1  ;;  %v359_v8 = vld [vmem:[#allocation9] sm:$0xff]  ;;  %v358_v9 = vld [vmem:[%s302_s13 + $0x8] sm:$0xff]  ;;  %s1048_s27 = scalar_lea.hbm %s1992_s6, %s1238_s11  ;;  %s351_s16 = scalar_lea.vmem [#allocation13], %s1188_s18 }
  0x39   : > { %511 = vmatpush.msra.mxu2 %v489_v4  ;;  %409 = vmatpush.msra.mxu1 %v396_v6  ;;  %v487_v10 = vld [vmem:[#allocation7] sm:$0xff]  ;;  %v394_v12 = vld [vmem:[#allocation10 + $0x8] sm:$0xff]  ;;  %s1049_s24 = sshll.u32 %s351_s16, 4  ;;  %s1051_s20 = sshll.u32 %s1048_s27, 4  ;;  %s1050_s24 = int_to_ptr.vmem [resolvable:$true] %s1049_s24  ;;  %s1052_s20 = int_to_ptr.hbm [resolvable:$true] %s1051_s20 }
  0x3a   : > { %1241 = vmatpush.msra.mxu3 %v360_v3  ;;  %384 = vmatpush.msra.mxu0 %v360_v3  ;;  %v485_v11 = vld [vmem:[%s302_s13] sm:$0xff]  ;;  %s1035_s8 = scalar_lea.sflag [#allocation6], %s1803_s28  ;;  %s1550_s9 = sshra.s32 %s1052_s20, 4  ;;  %s1551_s9 = int_to_ptr.hbm [resolvable:$true] %s1550_s9 }
  0x3b   : > { %512 = vmatpush.msra.mxu2 %v488_v5  ;;  %410 = vmatpush.msra.mxu1 %v395_v7  ;;  %v393_v13 = vld [vmem:[#allocation10] sm:$0xff]  ;;  %s1552_s18 = scalar_lea.hbm %s1551_s9, 16  ;;  %p1557_p11 = scmp.lt.s32.totalorder %s1551_s9, %s1992_s6 }
  0x3c   : > { %1242 = vmatpush.msra.mxu3 %v359_v8  ;;  %385 = vmatpush.msra.mxu0 %v359_v8  ;;  %p1553_p1 = scmp.ne.s32.totalorder %s1551_s9, %s1552_s18 }
  0x3d   : > { %1195 = vmatmul.msk.f32.vlgmr.msra.gmra.mxu3 %vm363_vm0, %v358_v9  ;;  %513 = vmatpush.msra.mxu2 %v487_v10 }
  0x3e   : > { %1198 = vmatmul.msk.f32.vlgmr.msra.gmra.mxu2 %vm363_vm0, %v485_v11  ;;  %1194 = vmatmul.msk.f32.vlgmr.msra.gmra.mxu0 %vm363_vm0, %v485_v11  ;;  %p1554_p3 = pnand %p1553_p1, %p1780_p2 }
  0x3f   : > { %411 = vmatpush.msra.mxu1 %v394_v12 }
  0x40   : > { %p1555_p7 = pneg %p1554_p3 }
  0x41   : > { %412 = vmatpush.msra.mxu1 %v393_v13 }
  0x42   : > { %1196 = vmatmul.msk.f32.vlgmr.msra.gmra.mxu1 %vm363_vm0, %v485_v11 }
  0x46   : > { %1199 = vmatmul.msk.f32.gmra.mxu2 %vm363_vm0, %v358_v9 }
  0x4a   : > { %1197 = vmatmul.msk.f32.gmra.mxu1 %vm363_vm0, %v358_v9 }
  0xbb   : > { %v387_v14 = vpop.f32.mrf.mxu0 }
  0xbc   : > { %421 = vst.msk [vmem:[#allocation2] sm:$0xff] %vm420_vm1, %v387_v14 }
  0xbf   : > { %v1845_v20 = vpop.f32.mrf.mxu1 }
  0xc0   : > { %v390_v15 = vpop.f32.mrf.mxu3  ;;  %423 = vst.msk [vmem:[#allocation3] sm:$0xff] %vm420_vm1, %v1845_v20 }
  0xc1   : > { %422 = vst.msk [vmem:[#allocation2 + $0x8] sm:$0xff] %vm420_vm1, %v390_v15  ;;  %449 = vrot.lane.b32.xlu2 %v390_v15, %s1634_s1  ;;  %429 = vrot.lane.b32.xlu1 %v390_v15, %s1635_s2  ;;  %v515_v16 = vpop.f32.mrf.mxu2 }
  0xc2   : > { %467 = vrot.lane.b32.xlu0 %v390_v15, %s1636_s3 }
  0xc3   : > { %v535_v18 = vld [vmem:[#allocation2] sm:$0xff] }
  0xc7   : > { %v1849_v21 = vpop.f32.mrf.mxu1  ;;  %v543_v40 = vld [vmem:[#allocation3] sm:$0xff] }
  0xc8   : > { %v536_v17 = vld [vmem:[#allocation2 + $0x8] sm:$0xff]  ;;  %424 = vst.msk [vmem:[#allocation3 + $0x8] sm:$0xff] %vm420_vm1, %v1849_v21 }
  0xc9   : > { %531 = vrot.lane.b32.xlu1 %v515_v16, %s1636_s3  ;;  %1200 = vmatpush.xpose.msk.msrb.mxu3 %vm420_vm1, %v536_v17  ;;  %v518_v19 = vpop.f32.mrf.mxu2 }
  0xca   : > { %427 = vrot.lane.b32.xlu2 %v387_v14, %s1635_s2  ;;  %465 = vrot.lane.b32.xlu0 %v387_v14, %s1636_s3 }
  0xcd   : > { %1201 = vmatpush.xpose.msk.msrb.mxu3 %vm420_vm1, %v535_v18 }
  0xcf   : > { %v544_v39 = vld [vmem:[#allocation3 + $0x8] sm:$0xff] }
  0xd0   : > { %1202 = vmatmul.msk.f32.vlgmr.msrb.gmra.mxu3 %vm420_vm1, %v515_v16 }
  0xd1   : > { %533 = vrot.lane.b32.xlu1 %v518_v19, %s1636_s3  ;;  %792 = vmatpush.msra.mxu3 %v544_v39 }
  0xd2   : > { %447 = vrot.lane.b32.xlu0 %v387_v14, %s1634_s1  ;;  %523 = vrot.lane.b32.xlu2 %v515_v16, %s1635_s2 }
  0xd3   : > { %793 = vmatpush.msra.mxu3 %v543_v40 }
  0xd8   : > { %1203 = vmatmul.msk.f32.gmra.mxu3 %vm420_vm1, %v518_v19 }
  0xd9   : > { %525 = vrot.lane.b32.xlu1 %v518_v19, %s1635_s2 }
  0xda   : > { %527 = vrot.lane.b32.xlu0 %v515_v16, %s1634_s1  ;;  %529 = vrot.lane.b32.xlu2 %v518_v19, %s1634_s1 }
  0xe2   : > { %476 = vrot.lane.b32.xlu2 %v1849_v21, %s1636_s3 }
 0x11b   : > { %v450_v22 = vpop.permute.xlu2 %449 }
 0x11c   : > { %455 = vst.msk [vmem:[#allocation2 + $0x28] sm:$0xff] %vm420_vm1, %v450_v22 }
 0x123   : > { %v540_v23 = vld [vmem:[#allocation2 + $0x28] sm:$0xff] }
 0x124   : > { %v428_v24 = vpop.permute.xlu2 %427  ;;  %1208 = vmatpush.xpose.msk.msrb.mxu1 %vm420_vm1, %v540_v23 }
 0x125   : > { %434 = vst.msk [vmem:[#allocation2 + $0x10] sm:$0xff] %vm420_vm1, %v428_v24 }
 0x12c   : > { %v537_v31 = vld [vmem:[#allocation2 + $0x10] sm:$0xff]  ;;  %v524_v32 = vpop.permute.xlu2 %523 }
 0x133   : > { %v430_v25 = vpop.permute.xlu1 %429 }
 0x134   : > { %435 = vst.msk [vmem:[#allocation2 + $0x18] sm:$0xff] %vm420_vm1, %v430_v25  ;;  %v468_v26 = vpop.permute.xlu0 %467  ;;  %v530_v43 = vpop.permute.xlu2 %529 }
 0x135   : > { %473 = vst.msk [vmem:[#allocation2 + $0x38] sm:$0xff] %vm420_vm1, %v468_v26 }
 0x13b   : > { %v532_v27 = vpop.permute.xlu1 %531  ;;  %v538_v28 = vld [vmem:[#allocation2 + $0x18] sm:$0xff] }
 0x13c   : > { %v466_v29 = vpop.permute.xlu0 %465  ;;  %1204 = vmatpush.xpose.msk.msrb.mxu0 %vm420_vm1, %v538_v28  ;;  %v542_v30 = vld [vmem:[#allocation2 + $0x38] sm:$0xff]  ;;  %v477_v46 = vpop.permute.xlu2 %476 }
 0x13d   : > { %472 = vst.msk [vmem:[#allocation2 + $0x30] sm:$0xff] %vm420_vm1, %v466_v29  ;;  %1212 = vmatpush.xpose.msk.msrb.mxu2 %vm420_vm1, %v542_v30 }
 0x13e   : > { %482 = vst.msk [vmem:[#allocation3 + $0x38] sm:$0xff] %vm420_vm1, %v477_v46 }
 0x140   : > { %1205 = vmatpush.xpose.msk.msrb.mxu0 %vm420_vm1, %v537_v31 }
 0x143   : > { %v534_v33 = vpop.permute.xlu1 %533  ;;  %1206 = vmatmul.msk.f32.vlgmr.msrb.gmra.mxu0 %vm420_vm1, %v524_v32 }
 0x144   : > { %v448_v34 = vpop.permute.xlu0 %447  ;;  %v541_v35 = vld [vmem:[#allocation2 + $0x30] sm:$0xff] }
 0x145   : > { %454 = vst.msk [vmem:[#allocation2 + $0x20] sm:$0xff] %vm420_vm1, %v448_v34  ;;  %1213 = vmatpush.xpose.msk.msrb.mxu2 %vm420_vm1, %v541_v35  ;;  %v550_v53 = vld [vmem:[#allocation3 + $0x38] sm:$0xff] }
 0x148   : > { %1214 = vmatmul.msk.f32.vlgmr.msrb.gmra.mxu2 %vm420_vm1, %v532_v27 }
 0x149   : > { %879 = vmatpush.msra.mxu2 %v550_v53 }
 0x14b   : > { %v526_v36 = vpop.permute.xlu1 %525 }
 0x14c   : > { %1207 = vmatmul.msk.f32.gmra.mxu0 %vm420_vm1, %v526_v36  ;;  %v539_v37 = vld [vmem:[#allocation2 + $0x20] sm:$0xff]  ;;  %v528_v38 = vpop.permute.xlu0 %527 }
 0x14d   : > { %1209 = vmatpush.xpose.msk.msrb.mxu1 %vm420_vm1, %v539_v37 }
 0x150   : > { %1210 = vmatmul.msk.f32.vlgmr.msrb.gmra.mxu1 %vm420_vm1, %v528_v38  ;;  %1215 = vmatmul.msk.f32.gmra.mxu2 %vm420_vm1, %v534_v33 }
 0x153   : > { %v579_v41 = vpop.f32.mrf.mxu3 }
 0x154   : > { %v684_v42 = vsel %vm420_vm1, %v579_v41, -inf }
 0x155   : > { %685 = vmax.xlane.f32.xlu0 %v684_v42 }
 0x158   : > { %1211 = vmatmul.msk.f32.gmra.mxu1 %vm420_vm1, %v530_v43 }
 0x15b   : > { %v582_v44 = vpop.f32.mrf.mxu3 }
 0x15c   : > { %v687_v45 = vsel %vm420_vm1, %v582_v44, -inf }
 0x15d   : > { %688 = vmax.xlane.f32.xlu2 %v687_v45 }
 0x169   : > { %440 = vrot.lane.b32.xlu0 %v1849_v21, %s1635_s2 }
 0x171   : > { %438 = vrot.lane.b32.xlu0 %v1845_v20, %s1635_s2 }
 0x1c0   : > { %v612_v47 = vpop.f32.mrf.mxu0 }
 0x1c1   : > { %v690_v48 = vsel %vm420_vm1, %v612_v47, -inf }
 0x1c2   : > { %691 = vmax.xlane.f32.xlu2 %v690_v48 }
 0x1c8   : > { %v686_v56 = vpop.xlane.xlu0 %685 }
 0x1c9   : > { %v615_v49 = vpop.f32.mrf.mxu0  ;;  %v708_v6 = vsub.f32 %v579_v41, %v686_v56 }
 0x1ca   : > { %v693_v50 = vsel %vm420_vm1, %v615_v49, -inf }
 0x1cb   : > { %694 = vmax.xlane.f32.xlu2 %v693_v50  ;;  %v678_v54 = vpop.f32.mrf.mxu2  ;;  %v716_v7 = vmul.f32 1.442695, %v708_v6 }
 0x1cc   : > { %v702_v59 = vsel %vm420_vm1, %v678_v54, -inf }
 0x1cd   : > { %v1882_v51 = vpop.f32.mrf.mxu1 }
 0x1ce   : > { %v696_v52 = vsel %vm420_vm1, %v1882_v51, -inf }
 0x1cf   : > { %697 = vmax.xlane.f32.xlu1 %v696_v52 }
 0x1d0   : > { %v689_v55 = vpop.xlane.xlu2 %688 }
 0x1d1   : > { %v709_v57 = vsub.f32 %v582_v44, %v689_v55 }
 0x1d3   : > { %v718_v61 = vmul.f32 1.442695, %v709_v57  ;;  %v681_v62 = vpop.f32.mrf.mxu2 }
 0x1d4   : > { %v705_v0 = vsel %vm420_vm1, %v681_v62, -inf }
 0x1d5   : > { %v648_v58 = vpop.f32.mrf.mxu1  ;;  %1354 = vpow2.f32 %v718_v61 }
 0x1d6   : > { %v699_v60 = vsel %vm420_vm1, %v648_v58, -inf  ;;  %1356 = vpow2.f32 %v716_v7 }
 0x1d7   : > { %703 = vmax.xlane.f32.xlu1 %v702_v59  ;;  %700 = vmax.xlane.f32.xlu0 %v699_v60 }
 0x1db   : > { %v441_v63 = vpop.permute.xlu0 %440  ;;  %v1890_v1 = vpop.eup %1354 }
 0x1dc   : > { %446 = vst.msk [vmem:[#allocation3 + $0x18] sm:$0xff] %vm420_vm1, %v441_v63  ;;  %v735_v3 = vsel %vm420_vm1, %v1890_v1, 0.0  ;;  %v1357_v8 = vpop.eup %1356 }
 0x1dd   : > { %v732_v9 = vsel %vm420_vm1, %v1357_v8, 0.0 }
 0x1df   : > { %706 = vmax.xlane.f32.xlu0 %v705_v0  ;;  %v889_v0 = vld [vmem:[#allocation12 + $0x8] sm:$0xff] }
 0x1e0   : > { %916 = vmatpush.msrb.mxu3 %v889_v0 }
 0x1e3   : > { %v439_v2 = vpop.permute.xlu0 %438  ;;  %v546_v4 = vld [vmem:[#allocation3 + $0x18] sm:$0xff] }
 0x1e4   : > { %445 = vst.msk [vmem:[#allocation3 + $0x10] sm:$0xff] %vm420_vm1, %v439_v2  ;;  %821 = vmatpush.msra.mxu0 %v546_v4  ;;  %v891_v2 = vld [vmem:[#allocation12 + $0x18] sm:$0xff] }
 0x1e7   : > { %736 = vadd.xlane.f32.xlu0 %v735_v3 }
 0x1eb   : > { %v545_v5 = vld [vmem:[#allocation3 + $0x10] sm:$0xff] }
 0x1ec   : > { %822 = vmatpush.msra.mxu0 %v545_v5 }
 0x1ee   : > { %945 = vmatpush.msrb.mxu0 %v891_v2 }
 0x1f0   : > { %474 = vrot.lane.b32.xlu1 %v1845_v20, %s1636_s3 }
 0x21a   : > { %733 = vadd.xlane.f32.xlu1 %v732_v9 }
 0x235   : > { %v692_v10 = vpop.xlane.xlu2 %691 }
 0x236   : > { %v710_v11 = vsub.f32 %v612_v47, %v692_v10  ;;  %v890_v10 = vld [vmem:[#allocation12 + $0x10] sm:$0xff] }
 0x237   : > { %946 = vmatpush.msrb.mxu0 %v890_v10 }
 0x238   : > { %v720_v12 = vmul.f32 1.442695, %v710_v11  ;;  %v895_v11 = vld [vmem:[#allocation12 + $0x38] sm:$0xff] }
 0x23a   : > { %1358 = vpow2.f32 %v720_v12 }
 0x23e   : > { %v695_v22 = vpop.xlane.xlu2 %694 }
 0x23f   : > { %v711_v26 = vsub.f32 %v615_v49, %v695_v22 }
 0x240   : > { %v1359_v13 = vpop.eup %1358 }
 0x241   : > { %v738_v14 = vsel %vm420_vm1, %v1359_v13, 0.0  ;;  %v722_v29 = vmul.f32 1.442695, %v711_v26 }
 0x242   : > { %v698_v15 = vpop.xlane.xlu1 %697  ;;  %739 = vadd.xlane.f32.xlu2 %v738_v14 }
 0x243   : > { %v712_v39 = vsub.f32 %v1882_v51, %v698_v15  ;;  %v893_v15 = vld [vmem:[#allocation12 + $0x28] sm:$0xff] }
 0x245   : > { %v724_v40 = vmul.f32 1.442695, %v712_v39 }
 0x24a   : > { %v704_v16 = vpop.xlane.xlu1 %703  ;;  %v701_v17 = vpop.xlane.xlu0 %700 }
 0x24b   : > { %v714_v18 = vsub.f32 %v678_v54, %v704_v16  ;;  %v713_v31 = vsub.f32 %v648_v58, %v701_v17  ;;  %v892_v16 = vld [vmem:[#allocation12 + $0x20] sm:$0xff] }
 0x24d   : > { %v728_v19 = vmul.f32 1.442695, %v714_v18  ;;  %v726_v33 = vmul.f32 1.442695, %v713_v31 }
 0x24f   : > { %1360 = vpow2.f32 %v728_v19 }
 0x252   : > { %v707_v23 = vpop.xlane.xlu0 %706 }
 0x253   : > { %v715_v24 = vsub.f32 %v681_v62, %v707_v23 }
 0x255   : > { %v1361_v25 = vpop.eup %1360  ;;  %v730_v27 = vmul.f32 1.442695, %v715_v24 }
 0x256   : > { %v750_v28 = vsel %vm420_vm1, %v1361_v25, 0.0 }
 0x257   : > { %1362 = vpow2.f32 %v730_v27  ;;  %751 = vadd.xlane.f32.xlu0 %v750_v28 }
 0x258   : > { %1364 = vpow2.f32 %v722_v29 }
 0x259   : > { %1366 = vpow2.f32 %v726_v33 }
 0x25a   : > { %456 = vrot.lane.b32.xlu2 %v1845_v20, %s1634_s1  ;;  %1368 = vpow2.f32 %v724_v40  ;;  %v737_v43 = vpop.xlane.xlu0 %736 }
 0x25d   : > { %v1363_v30 = vpop.eup %1362 }
 0x25e   : > { %v753_v32 = vsel %vm420_vm1, %v1363_v30, 0.0  ;;  %v1365_v35 = vpop.eup %1364 }
 0x25f   : > { %754 = vadd.xlane.f32.xlu1 %v753_v32  ;;  %v741_v36 = vsel %vm420_vm1, %v1365_v35, 0.0  ;;  %v1905_v38 = vpop.eup %1366 }
 0x260   : > { %v747_v20 = vsel %vm420_vm1, %v1905_v38, 0.0  ;;  %v1369_v42 = vpop.eup %1368 }
 0x261   : > { %v744_v45 = vsel %vm420_vm1, %v1369_v42, 0.0 }
 0x262   : > { %v475_v34 = vpop.permute.xlu1 %474 }
 0x263   : > { %481 = vst.msk [vmem:[#allocation3 + $0x30] sm:$0xff] %vm420_vm1, %v475_v34  ;;  %v1353_v34 = vld [vmem:[%s1991_s5] ss:$0 sm:$0xff] }
 0x267   : > { %742 = vadd.xlane.f32.xlu1 %v741_v36 }
 0x26a   : > { %v549_v37 = vld [vmem:[#allocation3 + $0x30] sm:$0xff] }
 0x26b   : > { %880 = vmatpush.msra.mxu2 %v549_v37  ;;  %458 = vrot.lane.b32.xlu0 %v1849_v21, %s1634_s1  ;;  %s1556_s1 = scalar_lea.hbm %s1992_s6, 32 }
 0x26c   : > { %p1558_p12 = scmp.lt.s32.totalorder %s1556_s1, %s1552_s18 }
 0x26d   : > { %1003 = vmatpush.msrb.mxu2 %v895_v11 }
 0x26e   : > { %p1559_p13 = por %p1558_p12, %p1557_p11 }
 0x26f   : > { %748 = vadd.xlane.f32.xlu1 %v747_v20 }
 0x270   : > { %p1560_p0 = pnand %p1559_p13, %p1555_p7 }
 0x28d   : > { %v734_v41 = vpop.xlane.xlu1 %733 }
 0x28e   : > { %1370 = vrcp.f32 %v734_v41 }
 0x28f   : > { %1372 = vrcp.f32 %v737_v43 }
 0x294   : > { %v1371_v44 = vpop.eup %1370 }
 0x295   : > { %v764_v46 = vmul.f32 %v1371_v44, %v1357_v8  ;;  %745 = vadd.xlane.f32.xlu0 %v744_v45  ;;  %v1373_v21 = vpop.eup %1372 }
 0x296   : > { %v765_v47 = vmul.f32 %v1373_v21, %v1890_v1  ;;  %v888_v1 = vld [vmem:[#allocation12] sm:$0xff] }
 0x297   : > { %1216 = vmatmul.msk.f32.vlgmr.msra.gmra.mxu3 %vm420_vm1, %v764_v46 }
 0x298   : > { %917 = vmatpush.msrb.mxu3 %v888_v1 }
 0x29f   : > { %1217 = vmatmul.msk.f32.gmra.mxu3 %vm420_vm1, %v765_v47 }
 0x2b5   : > { %v740_v48 = vpop.xlane.xlu2 %739 }
 0x2b6   : > { %1374 = vrcp.f32 %v740_v48 }
 0x2bc   : > { %v1375_v49 = vpop.eup %1374 }
 0x2bd   : > { %v766_v50 = vmul.f32 %v1375_v49, %v1359_v13  ;;  %v457_v51 = vpop.permute.xlu2 %456  ;;  %v894_v13 = vld [vmem:[#allocation12 + $0x30] sm:$0xff] }
 0x2be   : > { %463 = vst.msk [vmem:[#allocation3 + $0x20] sm:$0xff] %vm420_vm1, %v457_v51  ;;  %1004 = vmatpush.msrb.mxu2 %v894_v13 }
 0x2bf   : > { %1218 = vmatmul.msk.f32.vlgmr.msra.gmra.mxu0 %vm420_vm1, %v766_v50 }
 0x2c5   : > { %v547_v63 = vld [vmem:[#allocation3 + $0x20] sm:$0xff] }
 0x2ca   : > { %v752_v52 = vpop.xlane.xlu0 %751 }
 0x2cb   : > { %1376 = vrcp.f32 %v752_v52 }
 0x2d1   : > { %v1377_v53 = vpop.eup %1376 }
 0x2d2   : > { %v770_v54 = vmul.f32 %v1377_v53, %v1361_v25  ;;  %v755_v55 = vpop.xlane.xlu1 %754 }
 0x2d3   : > { %1378 = vrcp.f32 %v755_v55 }
 0x2d4   : > { %1222 = vmatmul.msk.f32.vlgmr.msra.gmra.mxu2 %vm420_vm1, %v770_v54 }
 0x2d9   : > { %v1379_v56 = vpop.eup %1378 }
 0x2da   : > { %v743_v57 = vpop.xlane.xlu1 %742  ;;  %v771_v58 = vmul.f32 %v1379_v56, %v1363_v30 }
 0x2db   : > { %1380 = vrcp.f32 %v743_v57 }
 0x2dc   : > { %1223 = vmatmul.msk.f32.gmra.mxu2 %vm420_vm1, %v771_v58 }
 0x2dd   : > { %v459_v59 = vpop.permute.xlu0 %458 }
 0x2de   : > { %464 = vst.msk [vmem:[#allocation3 + $0x28] sm:$0xff] %vm420_vm1, %v459_v59 }
 0x2e1   : > { %v1381_v60 = vpop.eup %1380 }
 0x2e2   : > { %v767_v61 = vmul.f32 %v1381_v60, %v1365_v35  ;;  %v749_v4 = vpop.xlane.xlu1 %748 }
 0x2e4   : > { %1219 = vmatmul.msk.f32.gmra.mxu0 %vm420_vm1, %v767_v61 }
 0x2e5   : > { %v548_v62 = vld [vmem:[#allocation3 + $0x28] sm:$0xff] }
 0x2e6   : > { %850 = vmatpush.msra.mxu1 %v548_v62 }
 0x2e8   : > { %851 = vmatpush.msra.mxu1 %v547_v63 }
 0x2ea   : > { %974 = vmatpush.msrb.mxu1 %v893_v15 }
 0x2ec   : > { %975 = vmatpush.msrb.mxu1 %v892_v16 }
 0x308   : > { %v746_v3 = vpop.xlane.xlu0 %745 }
 0x309   : > { %1382 = vrcp.f32 %v746_v3 }
 0x30a   : > { %1384 = vrcp.f32 %v749_v4 }
 0x30f   : > { %v1383_v5 = vpop.eup %1382 }
 0x310   : > { %v768_v6 = vmul.f32 %v1383_v5, %v1369_v42  ;;  %v1385_v7 = vpop.eup %1384 }
 0x311   : > { %v769_v8 = vmul.f32 %v1385_v7, %v1905_v38 }
 0x312   : > { %1220 = vmatmul.msk.f32.vlgmr.msra.gmra.mxu1 %vm420_vm1, %v768_v6 }
 0x31a   : > { %v795_v9 = vpop.f32.mrf.mxu3  ;;  %1221 = vmatmul.msk.f32.gmra.mxu1 %vm420_vm1, %v769_v8 }
 0x31b   : > { %1224 = vmatmul.msk.f32.vlgmr.msrb.gmra.mxu3 %vm420_vm1, %v795_v9 }
 0x322   : > { %v798_v12 = vpop.f32.mrf.mxu3 }
 0x323   : > { %1225 = vmatmul.msk.f32.gmra.mxu3 %vm420_vm1, %v798_v12 }
 0x33c   : > { %v824_v14 = vpop.f32.mrf.mxu0 }
 0x33d   : > { %1226 = vmatmul.msk.f32.vlgmr.msrb.gmra.mxu0 %vm420_vm1, %v824_v14 }
 0x357   : > { %v882_v17 = vpop.f32.mrf.mxu2 }
 0x358   : > { %1230 = vmatmul.msk.f32.vlgmr.msrb.gmra.mxu2 %vm420_vm1, %v882_v17 }
 0x35f   : > { %v885_v18 = vpop.f32.mrf.mxu2 }
 0x360   : > { %1231 = vmatmul.msk.f32.gmra.mxu2 %vm420_vm1, %v885_v18 }
 0x361   : > { %v827_v19 = vpop.f32.mrf.mxu0 }
 0x362   : > { %1227 = vmatmul.msk.f32.gmra.mxu0 %vm420_vm1, %v827_v19 }
 0x38f   : > { %v853_v22 = vpop.f32.mrf.mxu1 }
 0x390   : > { %1228 = vmatmul.msk.f32.vlgmr.msrb.gmra.mxu1 %vm420_vm1, %v853_v22 }
 0x397   : > { %v856_v23 = vpop.f32.mrf.mxu1 }
 0x398   : > { %1229 = vmatmul.msk.f32.gmra.mxu1 %vm420_vm1, %v856_v23 }
 0x39e   : > { %v919_v24 = vpop.f32.mrf.mxu3 }
 0x39f   : > { %v1012_v28 = vsel %vm363_vm0, %v919_v24, 0.0 }
 0x3a6   : > { %v922_v36 = vpop.f32.mrf.mxu3 }
 0x3a7   : > { %v1019_v39 = vsel %vm363_vm0, %v922_v36, 0.0 }
 0x3ba   : > { %v948_v25 = vpop.f32.mrf.mxu0 }
 0x3bb   : > { %v1013_v26 = vsel %vm363_vm0, %v948_v25, 0.0 }
 0x3bc   : > { %v1014_v29 = vadd.f32 %v1013_v26, %v1012_v28 }
 0x3db   : > { %v1006_v27 = vpop.f32.mrf.mxu2 }
 0x3dc   : > { %v1017_v35 = vsel %vm363_vm0, %v1006_v27, 0.0 }
 0x3df   : > { %v951_v32 = vpop.f32.mrf.mxu0 }
 0x3e0   : > { %v1020_v38 = vsel %vm363_vm0, %v951_v32, 0.0 }
 0x3e1   : > { %v1021_v40 = vadd.f32 %v1020_v38, %v1019_v39 }
 0x3e3   : > { %v1009_v41 = vpop.f32.mrf.mxu2 }
 0x3e4   : > { %v1024_v45 = vsel %vm363_vm0, %v1009_v41, 0.0 }
 0x40d   : > { %v977_v30 = vpop.f32.mrf.mxu1 }
 0x40e   : > { %v1015_v31 = vsel %vm363_vm0, %v977_v30, 0.0 }
 0x40f   : > { %v1016_v33 = vadd.f32 %v1015_v31, %v1014_v29 }
 0x411   : > { %v1018_v37 = vadd.f32 %v1017_v35, %v1016_v33 }
 0x413   : > { %v1030_v20 = vadd.f32 %v1353_v34, %v1018_v37 }
 0x415   : > { %1032 = vst.msk [vmem:[%s351_s16] sm:$0xff] %vm363_vm0, %v1030_v20  ;;  %v980_v42 = vpop.f32.mrf.mxu1 }
 0x416   : > { %v1022_v43 = vsel %vm363_vm0, %v980_v42, 0.0 }
 0x417   : > { %v1023_v44 = vadd.f32 %v1022_v43, %v1021_v40 }
 0x419   : > { %v1025_v46 = vadd.f32 %v1024_v45, %v1023_v44 }
 0x41b   : > { %v1031_v21 = vadd.f32 %v1353_v34, %v1025_v46 }
 0x41d   : > { %1033 = vst.msk [vmem:[%s351_s16 + $0x8] sm:$0xff] %vm363_vm0, %v1031_v21 }
 0x41e   : > { %1563 = shalt.err (!%p1560_p0)
}
 0x41f   : > { %s1637_s28 = smov 128   ;;  %s1638_s29 = smov 8  }
 0x420   : > { %1261 = dma.vmem_to_hbm [thread:$0]  (%p1780_p2), %s1050_s24, 256, %s1052_s20, %s1035_s8, %s1637_s28, %s1637_s28, %s1638_s29  }
 0x421 PF: > { %s1066_s30 = sand.u32 1, %s1606_s21   ;;  %p1281_p4 = pnand %p1183_p10, %p1721_p5 }
 0x422   : > { %s1067_s11 = scalar_lea.sflag [#allocation6], %s1066_s30 }
 0x423   : > { %p1282_p6 = pneg %p1281_p4 }
 0x425   : > { %1601 = dma.done.wait (%p1282_p6), %s1067_s11, 256  }
 0x426   : > { %1603 = vsyncadd (%p1282_p6), %s1067_s11, 4294967040  ;;  %s24_s26 = sadd.s32 1, %s1626_s26   ;;  %s2009_s21 = smov %s1610_s22 }
 0x427   : > { %p21_p8 = scmp.ge.s32.totalorder %s24_s26, 4   ;;  %s2010_s22 = smov %s1614_s23 }
 0x428   : > { %s2011_s23 = smov %s1790_s15  ;;  %s2012_s24 = smov %s1622_s25 }
 0x429   : > { %s2013_s25 = smov %s2015_s17  ;;  %23 = sbr.rel (!%p21_p8) target bundleno = 12 (0xc), region = 116 }
 0x42e   :  { %1073 = vsyncpa [#allocation5], 1 }
 0x42f   :  { %1075 = vsyncpa [#allocation5 + $0x1], 1 }
 0x430   :  { %1076 = vsyncpa [#allocation8], 1 }
 0x431   :  { %1077 = vsyncpa [#allocation11], 1 }
 0x432   :  { %1078 = vsyncpa [#allocation6], 1 }
 0x433   :  { %1080 = vsyncpa [#allocation6 + $0x1], 1 }

</bundles_post_ra>
